<compile_context>
chip_gen: v7x
topology: tpu7x:2x2x1
jax: 0.10.0
libtpu: 0.0.40
codegen_flags: <defaults>
</compile_context>

<pallas_src>
import functools

import jax
import jax.numpy as jnp
from jax import lax
from jax.experimental import pallas as pl
from jax.experimental.pallas import tpu as pltpu

EPS = 1e-5


def _round_up(x, m):
    return (x + m - 1) // m * m


def _tpu_defaults():
    """(vmem_limit_bytes, default batch tile) per TPU generation."""
    try:
        cap = int(pltpu.get_tpu_info().vmem_capacity_bytes)
    except Exception:                       # query unavailable -> assume smallest (v7x: 64 MiB)
        cap = 64 * 1024 * 1024
    if cap >= 128 * 1024 * 1024:            # v4 / v5e / v5p / v6e
        return 96 * 1024 * 1024, 1024
    return min(48 * 1024 * 1024, cap * 3 // 4), 512   # v7x


# ---------------- phase 1a: Gram-matrix batch statistics (F <= H) -----------
def _gram_stats_kernel(x_ref, g_ref, s_ref, *, bm, tiles_per, batch):
    i = pl.program_id(1)

    @pl.when(i == 0)
    def _():
        g_ref[...] = jnp.zeros_like(g_ref)
        s_ref[...] = jnp.zeros_like(s_ref)

    tile = pl.program_id(0) * tiles_per + i
    rows = tile * bm + lax.broadcasted_iota(jnp.int32, (bm, 1), 0)
    xb = jnp.where(rows < batch, x_ref[...], 0.0).astype(jnp.bfloat16)

    # G += x^T x  (contraction over the batch rows, f32 accumulation on the MXU)
    g_ref[0] += lax.dot_general(xb, xb, (((0,), (0,)), ((), ())),
                                preferred_element_type=jnp.float32)
    f = xb.shape[1]
    # Sublane-partial column sums; the final 8->1 reduce happens once in the XLA fold.
    s_ref[...] += xb.astype(jnp.float32).reshape(bm // 8, 8, f).sum(axis=0)


# ---------------- phase 1b: h-based batch statistics (F > H fallback) -------
def _hstats_kernel(x_ref, w1_ref, sum_ref, sq_ref, *, bm, tiles_per, batch):
    i = pl.program_id(1)

    @pl.when(i == 0)
    def _():
        sum_ref[...] = jnp.zeros_like(sum_ref)
        sq_ref[...] = jnp.zeros_like(sq_ref)

    tile = pl.program_id(0) * tiles_per + i
    rows = tile * bm + lax.broadcasted_iota(jnp.int32, (bm, 1), 0)
    xb = jnp.where(rows < batch, x_ref[...], 0.0).astype(jnp.bfloat16)
    h = jnp.dot(xb, w1_ref[...], preferred_element_type=jnp.float32)
    hp = h.shape[1]
    hr = h.reshape(bm // 8, 8, hp)
    sum_ref[...] += hr.sum(axis=0)
    sq_ref[...] += (hr * hr).sum(axis=0)


# ---------------- phase 2: x@W1 -> folded BN affine -> ReLU -> @W2 + b2 -----
def _apply_kernel(x_ref, w1_ref, scale_ref, shift_ref, w2_ref, b2_ref, o_ref):
    xb = x_ref[...].astype(jnp.bfloat16)
    h = jnp.dot(xb, w1_ref[...], preferred_element_type=jnp.float32)
    h = jnp.maximum(h * scale_ref[...] + shift_ref[...], 0.0)
    o_ref[...] = (jnp.dot(h.astype(jnp.bfloat16), w2_ref[...],
                          preferred_element_type=jnp.float32) + b2_ref[...])


def _pick_bm(B, F, H_p, O_p, block_b, vmem_limit, use_gram, rbuf):
    """Largest batch tile (multiple of 8, preferably 16) whose VMEM footprint fits."""
    def est(bm):
        w_res = rbuf * ((F * H_p + H_p * O_p) * 2 + (2 * H_p + O_p) * 4)
        x_stream = 2 * bm * F * 4                 # f32 x tiles, double buffered
        o_stream = 2 * bm * O_p * 4
        p2 = w_res + x_stream + o_stream + 2 * bm * H_p * 4 + bm * (F + H_p) * 2
        if use_gram:
            p1 = 2 * (F * F + 8 * F) * 4 + x_stream + bm * F * 10
        else:
            p1 = rbuf * F * H_p * 2 + 4 * 2 * 8 * H_p * 4 + x_stream + bm * (F * 2 + H_p * 8)
        return max(p1, p2)

    bm = max(8, min(block_b, _round_up(B, 8)))
    if bm >= 32:
        bm = bm // 16 * 16                        # bf16 sublane packing
    while bm > 8 and est(bm) > vmem_limit * 3 // 4:
        bm = max(8, bm // 2 // 8 * 8)
    if est(bm) > vmem_limit:
        # TODO(synk): add a K-tiled (reduction over F/H) variant for models whose weight
        # matrices do not fit resident in VMEM.
        raise ValueError("W1/W2 too large to keep resident in VMEM for this kernel; "
                         "a K-tiled variant over F/H is required.")
    return bm


def _forward(x, params, *, block_b, single_buffer_resident):
    B, F = x.shape
    H = params["w1"].shape[1]
    O = params["w2"].shape[1]
    H_p = _round_up(H, 128)
    O_p = _round_up(O, 128)

    vmem_limit, default_bb = _tpu_defaults()
    if block_b is None:
        block_b = default_bb

    # Gram stats (2*B*F^2 flops) beat recomputing x@W1 (2*B*F*H_p) whenever F <= H,
    # provided the [F, F] accumulator comfortably fits VMEM.
    use_gram = (F <= H_p) and (2 * F * F * 4 <= vmem_limit // 4)
    rbuf = 1 if single_buffer_resident else 2

    bm = _pick_bm(B, F, H_p, O_p, block_b, vmem_limit, use_gram, rbuf)
    n_tiles = (B + bm - 1) // bm
    n_par = 2 if n_tiles >= 2 else 1              # per-core partial stats (v7x megacore)
    tiles_per = (n_tiles + n_par - 1) // n_par

    f32, bf16 = jnp.float32, jnp.bfloat16
    # Weights: pad H/O to lane-dense multiples of 128 and pre-cast to bf16 (MXU-native).
    # x stays un-padded/un-copied in HBM (cast to bf16 inside the kernels).
    w1_b = jnp.zeros((F, H_p), bf16).at[:, :H].set(params["w1"].astype(bf16))
    w2_b = jnp.zeros((H_p, O_p), bf16).at[:H, :O].set(params["w2"].astype(bf16))
    gamma_p = jnp.zeros((1, H_p), f32).at[:, :H].set(params["gamma"].reshape(1, H).astype(f32))
    beta_p = jnp.zeros((1, H_p), f32).at[:, :H].set(params["beta"].reshape(1, H).astype(f32))
    b2_p = jnp.zeros((1, O_p), f32).at[:, :O].set(params["b2"].reshape(1, O).astype(f32))

    def resident(shape, imap):
        # Blocks whose index never changes: single-buffer them to save VMEM.
        if single_buffer_resident:
            return pl.BlockSpec(shape, imap, pipeline_mode=pl.Buffered(1))
        return pl.BlockSpec(shape, imap)

    # ---------------- phase 1: global batch statistics ----------------------
    x_spec_p1 = pl.BlockSpec(
        (bm, F), lambda c, i: (jnp.minimum(c * tiles_per + i, n_tiles - 1), 0))
    cp_p1 = pltpu.CompilerParams(
        dimension_semantics=("parallel", "arbitrary"), vmem_limit_bytes=vmem_limit)

    if use_gram:
        kern = functools.partial(_gram_stats_kernel, bm=bm, tiles_per=tiles_per, batch=B)
        g_parts, s_parts = pl.pallas_call(
            kern,
            grid=(n_par, tiles_per),
            in_specs=[x_spec_p1],
            out_specs=(pl.BlockSpec((1, F, F), lambda c, i: (c, 0, 0)),
                       pl.BlockSpec((8, F), lambda c, i: (c, 0))),
            out_shape=(jax.ShapeDtypeStruct((n_par, F, F), f32),
                       jax.ShapeDtypeStruct((n_par * 8, F), f32)),
            compiler_params=cp_p1,
            cost_estimate=pl.CostEstimate(
                flops=2 * n_par * tiles_per * bm * F * F,
                transcendentals=0,
                bytes_accessed=4 * B * F + 4 * n_par * (F * F + 8 * F)),
        )(x)
        gram = jnp.sum(g_parts, axis=0)                       # [F, F]
        colsum_x = jnp.sum(s_parts, axis=0, keepdims=True)    # [1, F]
        w1f = w1_b.astype(f32)
        mean = (colsum_x @ w1f) / B
        mean_sq = jnp.sum(w1f * (gram @ w1f), axis=0, keepdims=True) / B
    else:
        kern = functools.partial(_hstats_kernel, bm=bm, tiles_per=tiles_per, batch=B)
        sum_parts, sq_parts = pl.pallas_call(
            kern,
            grid=(n_par, tiles_per),
            in_specs=[x_spec_p1, resident((F, H_p), lambda c, i: (0, 0))],
            out_specs=(pl.BlockSpec((8, H_p), lambda c, i: (c, 0)),
                       pl.BlockSpec((8, H_p), lambda c, i: (c, 0))),
            out_shape=(jax.ShapeDtypeStruct((n_par * 8, H_p), f32),
                       jax.ShapeDtypeStruct((n_par * 8, H_p), f32)),
            compiler_params=cp_p1,
            cost_estimate=pl.CostEstimate(
                flops=2 * n_par * tiles_per * bm * F * H_p + 3 * B * H_p,
                transcendentals=0,
                bytes_accessed=4 * B * F + 2 * F * H_p + 8 * n_par * 8 * H_p),
        )(x, w1_b)
        mean = jnp.sum(sum_parts, axis=0, keepdims=True) / B
        mean_sq = jnp.sum(sq_parts, axis=0, keepdims=True) / B

    # Fold BN into one per-column affine (b1 cancels exactly in mean-centering).
    var = jnp.maximum(mean_sq - mean * mean, 0.0)              # biased batch variance
    scale = gamma_p * lax.rsqrt(var + EPS)
    shift = beta_p - mean * scale

    # ---------------- phase 2: batch-parallel apply --------------------------
    out = pl.pallas_call(
        _apply_kernel,
        grid=(n_tiles,),
        in_specs=[pl.BlockSpec((bm, F), lambda i: (i, 0)),
                  resident((F, H_p), lambda i: (0, 0)),
                  resident((1, H_p), lambda i: (0, 0)),
                  resident((1, H_p), lambda i: (0, 0)),
                  resident((H_p, O_p), lambda i: (0, 0)),
                  resident((1, O_p), lambda i: (0, 0))],
        out_specs=pl.BlockSpec((bm, O_p), lambda i: (i, 0)),
        out_shape=jax.ShapeDtypeStruct((B, O_p), f32),
        compiler_params=pltpu.CompilerParams(
            dimension_semantics=("parallel",), vmem_limit_bytes=vmem_limit),
        cost_estimate=pl.CostEstimate(
            flops=2 * n_tiles * bm * (F * H_p + H_p * O_p) + 3 * B * H_p,
            transcendentals=0,
            bytes_accessed=4 * B * F + 2 * (F * H_p + H_p * O_p) + 4 * B * O_p),
    )(x, w1_b, scale, shift, w2_b, b2_p)

    return out[:, :O]


def nn_for_num_features(x, params, *, block_b=None):
    """Forward pass of NN_for_num_Features (BatchNorm1d in training mode, batch stats)."""
    try:
        out = _forward(x, params, block_b=block_b, single_buffer_resident=True)
        return jax.block_until_ready(out)
    except Exception:
        # pl.Buffered(1) (single-buffered resident weights) is a newer knob; fall back to
        # default double-buffered pipelining if this jax/libtpu combination rejects it.
        return _forward(x, params, block_b=block_b, single_buffer_resident=False)


# ---------------- parameter init & references --------------------------------
def init_params(key, num_features, hidden_dim, output_dim):
    k1, k2, k3, k4 = jax.random.split(key, 4)
    bound1 = 1.0 / jnp.sqrt(num_features)
    bound2 = 1.0 / jnp.sqrt(hidden_dim)
    w1 = jax.random.uniform(k1, (hidden_dim, num_features), jnp.float32, -bound1, bound1)
    b1 = jax.random.uniform(k2, (hidden_dim,), jnp.float32, -bound1, bound1)
    w2 = jax.random.uniform(k3, (output_dim, hidden_dim), jnp.float32, -bound2, bound2)
    b2 = jax.random.uniform(k4, (output_dim,), jnp.float32, -bound2, bound2)
    return {
        "w1": w1.T,                                   # [F, H]
        "b1": b1.reshape(1, hidden_dim),              # [1, H] (reference only; cancels in BN)
        "gamma": jnp.ones((1, hidden_dim), jnp.float32),
        "beta": jnp.zeros((1, hidden_dim), jnp.float32),
        "w2": w2.T,                                   # [H, O]
        "b2": b2.reshape(1, output_dim),              # [1, O]
    }


def reference_f32(x, params):
    # PyTorch training-mode forward in f32 (including b1).
    h = x @ params["w1"] + params["b1"]
    mean = jnp.mean(h, axis=0, keepdims=True)
    var = jnp.mean((h - mean) ** 2, axis=0, keepdims=True)
    hn = (h - mean) / jnp.sqrt(var + EPS) * params["gamma"] + params["beta"]
    hn = jnp.maximum(hn, 0.0)
    return hn @ params["w2"] + params["b2"]


def reference_bf16_matched(x, params):
    # Same math as the kernel (bf16 MXU operands, f32 accumulation, b1 dropped,
    # var = E[h^2] - E[h]^2) -> tight structural check.
    xb = x.astype(jnp.bfloat16)
    w1b = params["w1"].astype(jnp.bfloat16)
    w2b = params["w2"].astype(jnp.bfloat16)
    h = jnp.dot(xb, w1b, preferred_element_type=jnp.float32)
    mean = jnp.mean(h, axis=0, keepdims=True)
    mean_sq = jnp.mean(h * h, axis=0, keepdims=True)
    var = jnp.maximum(mean_sq - mean * mean, 0.0)
    scale = params["gamma"] * lax.rsqrt(var + EPS)
    shift = params["beta"] - mean * scale
    hn = jnp.maximum(h * scale + shift, 0.0)
    return jnp.dot(hn.astype(jnp.bfloat16), w2b,
                   preferred_element_type=jnp.float32) + params["b2"]


if __name__ == "__main__":
    configs = [
        dict(B=8, F=16, H=32, O=8, block_b=None),    # Gram stats path, single tile
        dict(B=200, F=64, H=48, O=24, block_b=64),   # F > H -> h-stats path, tail masking, 2-way split
        dict(B=200, F=32, H=64, O=16, block_b=64),   # Gram path, multi-tile + tail masking
    ]
    key = jax.random.PRNGKey(0)
    for cfg in configs:
        key, kx, kp = jax.random.split(key, 3)
        x = jax.random.normal(kx, (cfg["B"], cfg["F"]), jnp.float32)
        params = init_params(kp, cfg["F"], cfg["H"], cfg["O"])

        out = nn_for_num_features(x, params, block_b=cfg["block_b"])
        out = jax.block_until_ready(out)
        assert out.shape == (cfg["B"], cfg["O"])

        ref_m = reference_bf16_matched(x, params)
        ref_f = reference_f32(x, params)
        assert jnp.allclose(out, ref_m, atol=2e-3, rtol=2e-3), f"mismatch vs matched ref {cfg}"
        # bf16 MXU operands: ~1e-2-level deviation from the pure-f32 reference is expected.
        assert jnp.allclose(out, ref_f, atol=1e-1, rtol=1e-1), f"mismatch vs f32 ref {cfg}"

    print("KERNEL_OK")
</pallas_src>

<mosaic_0001>
module attributes {stable_mosaic.version = 11 : i64} {
  func.func @_gram_stats_kernel(%arg0: i32, %arg1: i32, %arg2: memref<8x16xf32, #tpu.memory_space<vmem>>, %arg3: memref<1x16x16xf32, #tpu.memory_space<vmem>>, %arg4: memref<8x16xf32, #tpu.memory_space<vmem>>) attributes {dimension_semantics = [#tpu.dimension_semantics<parallel>, #tpu.dimension_semantics<arbitrary>], iteration_bounds = array<i64: 1, 1>, scalar_prefetch = 0 : i64, scratch_operands = 0 : i64, tpu.core_type = #tpu.core_type<tc>, window_params = [{transform_indices = @transform_0, window_bounds = array<i64: 8, 16>}, {transform_indices = @transform_1, window_bounds = array<i64: 1, 16, 16>}, {transform_indices = @transform_2, window_bounds = array<i64: 8, 16>}]} {
    %c0_i32 = arith.constant 0 : i32
    %0 = arith.cmpi eq, %arg1, %c0_i32 : i32
    %1 = arith.extui %0 : i1 to i32
    %c0_i32_0 = arith.constant 0 : i32
    %2 = arith.cmpi ne, %1, %c0_i32_0 : i32
    scf.if %2 {
      %cst_15 = arith.constant 0.000000e+00 : f32
      %30 = vector.broadcast %cst_15 : f32 to vector<1x16x16xf32>
      %c0_16 = arith.constant 0 : index
      %c0_17 = arith.constant 0 : index
      %c0_18 = arith.constant 0 : index
      %31 = vector.load %arg3[%c0_16, %c0_17, %c0_18] : memref<1x16x16xf32, #tpu.memory_space<vmem>>, vector<1x16x16xf32>
      tpu.vector_store %arg3[%c0_16, %c0_17, %c0_18], %30 {strides = array<i32>} : memref<1x16x16xf32, #tpu.memory_space<vmem>>, vector<1x16x16xf32>,
      %cst_19 = arith.constant 0.000000e+00 : f32
      %32 = vector.broadcast %cst_19 : f32 to vector<8x16xf32>
      %c0_20 = arith.constant 0 : index
      %c0_21 = arith.constant 0 : index
      %33 = vector.load %arg4[%c0_20, %c0_21] : memref<8x16xf32, #tpu.memory_space<vmem>>, vector<8x16xf32>
      tpu.vector_store %arg4[%c0_20, %c0_21], %32 {strides = array<i32>} : memref<8x16xf32, #tpu.memory_space<vmem>>, vector<8x16xf32>,
    } else {
    }
    %c1_i32 = arith.constant 1 : i32
    %3 = arith.muli %arg0, %c1_i32 : i32
    %4 = arith.addi %3, %arg1 : i32
    %c8_i32 = arith.constant 8 : i32
    %5 = arith.muli %4, %c8_i32 : i32
    %6 = tpu.iota {dimensions = array<i32: 0>} : vector<8x1xi32>
    %7 = vector.broadcast %5 : i32 to vector<8x1xi32>
    %8 = arith.addi %7, %6 : vector<8x1xi32>
    %c8_i32_1 = arith.constant 8 : i32
    %9 = vector.broadcast %c8_i32_1 : i32 to vector<8x1xi32>
    %10 = arith.cmpi slt, %8, %9 : vector<8x1xi32>
    %c0 = arith.constant 0 : index
    %c0_2 = arith.constant 0 : index
    %11 = vector.load %arg2[%c0, %c0_2] : memref<8x16xf32, #tpu.memory_space<vmem>>, vector<8x16xf32>
    %cst = arith.constant 0.000000e+00 : f32
    %12 = vector.shape_cast %10 : vector<8x1xi1> to vector<8x1xi1>
    %13 = vector.broadcast %12 : vector<8x1xi1> to vector<8x16xi1>
    %14 = vector.broadcast %cst : f32 to vector<8x16xf32>
    %15 = arith.select %13, %11, %14 : vector<8x16xi1>, vector<8x16xf32>
    %16 = arith.truncf %15 : vector<8x16xf32> to vector<8x16xbf16>
    %c0_3 = arith.constant 0 : index
    %c0_4 = arith.constant 0 : index
    %c0_5 = arith.constant 0 : index
    %17 = vector.load %arg3[%c0_3, %c0_4, %c0_5] : memref<1x16x16xf32, #tpu.memory_space<vmem>>, vector<1x16x16xf32>
    %18 = vector.shape_cast %17 : vector<1x16x16xf32> to vector<16x16xf32>
    %cst_6 = arith.constant dense<0.000000e+00> : vector<16x16xf32>
    %19 = tpu.matmul %16, %16, %cst_6 {dimension_numbers = #tpu.dot_dimension_numbers<[0], [0], [1], [1], [0, 1, 1, 1], [], []>} : vector<8x16xbf16>, vector<8x16xbf16>, vector<16x16xf32> -> vector<16x16xf32>
    %20 = arith.addf %18, %19 : vector<16x16xf32>
    %c0_7 = arith.constant 0 : index
    %c0_8 = arith.constant 0 : index
    %c0_9 = arith.constant 0 : index
    %21 = vector.load %arg3[%c0_7, %c0_8, %c0_9] : memref<1x16x16xf32, #tpu.memory_space<vmem>>, vector<1x16x16xf32>
    %22 = vector.shape_cast %21 : vector<1x16x16xf32> to vector<16x16xf32>
    %23 = vector.shape_cast %20 : vector<16x16xf32> to vector<1x16x16xf32>
    tpu.vector_store %arg3[%c0_7, %c0_8, %c0_9], %23 {strides = array<i32>} : memref<1x16x16xf32, #tpu.memory_space<vmem>>, vector<1x16x16xf32>,
    %c0_10 = arith.constant 0 : index
    %c0_11 = arith.constant 0 : index
    %24 = vector.load %arg4[%c0_10, %c0_11] : memref<8x16xf32, #tpu.memory_space<vmem>>, vector<8x16xf32>
    %25 = arith.extf %16 : vector<8x16xbf16> to vector<8x16xf32>
    %26 = vector.shape_cast %25 : vector<8x16xf32> to vector<1x8x16xf32>
    %cst_12 = arith.constant dense<0.000000e+00> : vector<8x16xf32>
    %27 = vector.multi_reduction <add>, %26, %cst_12 [0] : vector<1x8x16xf32> to vector<8x16xf32>
    %28 = arith.addf %24, %27 : vector<8x16xf32>
    %c0_13 = arith.constant 0 : index
    %c0_14 = arith.constant 0 : index
    %29 = vector.load %arg4[%c0_13, %c0_14] : memref<8x16xf32, #tpu.memory_space<vmem>>, vector<8x16xf32>
    tpu.vector_store %arg4[%c0_13, %c0_14], %28 {strides = array<i32>} : memref<8x16xf32, #tpu.memory_space<vmem>>, vector<8x16xf32>,
    return
  }
  func.func @transform_0(%arg0: i32, %arg1: i32) -> (i32, i32) {
    %c1_i32 = arith.constant 1 : i32
    %0 = arith.muli %arg0, %c1_i32 : i32
    %1 = arith.addi %0, %arg1 : i32
    %c0_i32 = arith.constant 0 : i32
    %2 = arith.minsi %1, %c0_i32 : i32
    %c0_i32_0 = arith.constant 0 : i32
    %c0_i32_1 = arith.constant 0 : i32
    return %2, %c0_i32_0 : i32, i32
  }
  func.func @transform_1(%arg0: i32, %arg1: i32) -> (i32, i32, i32) {
    %c0_i32 = arith.constant 0 : i32
    %c0_i32_0 = arith.constant 0 : i32
    %c0_i32_1 = arith.constant 0 : i32
    return %arg0, %c0_i32, %c0_i32_0 : i32, i32, i32
  }
  func.func @transform_2(%arg0: i32, %arg1: i32) -> (i32, i32) {
    %c0_i32 = arith.constant 0 : i32
    %c0_i32_0 = arith.constant 0 : i32
    return %arg0, %c0_i32 : i32, i32
  }
}

module attributes {stable_mosaic.version = 11 : i64} {
  func.func @_gram_stats_kernel(%arg0: i32, %arg1: i32, %arg2: memref<8x16xf32, #tpu.memory_space<vmem>>, %arg3: memref<1x16x16xf32, #tpu.memory_space<vmem>>, %arg4: memref<8x16xf32, #tpu.memory_space<vmem>>) attributes {dimension_semantics = [#tpu.dimension_semantics<parallel>, #tpu.dimension_semantics<arbitrary>], iteration_bounds = array<i64: 1, 1>, scalar_prefetch = 0 : i64, scratch_operands = 0 : i64, tpu.core_type = #tpu.core_type<tc>, window_params = [{transform_indices = @transform_0, window_bounds = array<i64: 8, 16>}, {transform_indices = @transform_1, window_bounds = array<i64: 1, 16, 16>}, {transform_indices = @transform_2, window_bounds = array<i64: 8, 16>}]} {
    %c0_i32 = arith.constant 0 : i32
    %0 = arith.cmpi eq, %arg1, %c0_i32 : i32
    %1 = arith.extui %0 : i1 to i32
    %c0_i32_0 = arith.constant 0 : i32
    %2 = arith.cmpi ne, %1, %c0_i32_0 : i32
    scf.if %2 {
      %cst_15 = arith.constant 0.000000e+00 : f32
      %30 = vector.broadcast %cst_15 : f32 to vector<1x16x16xf32>
      %c0_16 = arith.constant 0 : index
      %c0_17 = arith.constant 0 : index
      %c0_18 = arith.constant 0 : index
      %31 = vector.load %arg3[%c0_16, %c0_17, %c0_18] : memref<1x16x16xf32, #tpu.memory_space<vmem>>, vector<1x16x16xf32>
      tpu.vector_store %arg3[%c0_16, %c0_17, %c0_18], %30 {strides = array<i32>} : memref<1x16x16xf32, #tpu.memory_space<vmem>>, vector<1x16x16xf32>,
      %cst_19 = arith.constant 0.000000e+00 : f32
      %32 = vector.broadcast %cst_19 : f32 to vector<8x16xf32>
      %c0_20 = arith.constant 0 : index
      %c0_21 = arith.constant 0 : index
      %33 = vector.load %arg4[%c0_20, %c0_21] : memref<8x16xf32, #tpu.memory_space<vmem>>, vector<8x16xf32>
      tpu.vector_store %arg4[%c0_20, %c0_21], %32 {strides = array<i32>} : memref<8x16xf32, #tpu.memory_space<vmem>>, vector<8x16xf32>,
    } else {
    }
    %c1_i32 = arith.constant 1 : i32
    %3 = arith.muli %arg0, %c1_i32 : i32
    %4 = arith.addi %3, %arg1 : i32
    %c8_i32 = arith.constant 8 : i32
    %5 = arith.muli %4, %c8_i32 : i32
    %6 = tpu.iota {dimensions = array<i32: 0>} : vector<8x1xi32>
    %7 = vector.broadcast %5 : i32 to vector<8x1xi32>
    %8 = arith.addi %7, %6 : vector<8x1xi32>
    %c8_i32_1 = arith.constant 8 : i32
    %9 = vector.broadcast %c8_i32_1 : i32 to vector<8x1xi32>
    %10 = arith.cmpi slt, %8, %9 : vector<8x1xi32>
    %c0 = arith.constant 0 : index
    %c0_2 = arith.constant 0 : index
    %11 = vector.load %arg2[%c0, %c0_2] : memref<8x16xf32, #tpu.memory_space<vmem>>, vector<8x16xf32>
    %cst = arith.constant 0.000000e+00 : f32
    %12 = vector.shape_cast %10 : vector<8x1xi1> to vector<8x1xi1>
    %13 = vector.broadcast %12 : vector<8x1xi1> to vector<8x16xi1>
    %14 = vector.broadcast %cst : f32 to vector<8x16xf32>
    %15 = arith.select %13, %11, %14 : vector<8x16xi1>, vector<8x16xf32>
    %16 = arith.truncf %15 : vector<8x16xf32> to vector<8x16xbf16>
    %c0_3 = arith.constant 0 : index
    %c0_4 = arith.constant 0 : index
    %c0_5 = arith.constant 0 : index
    %17 = vector.load %arg3[%c0_3, %c0_4, %c0_5] : memref<1x16x16xf32, #tpu.memory_space<vmem>>, vector<1x16x16xf32>
    %18 = vector.shape_cast %17 : vector<1x16x16xf32> to vector<16x16xf32>
    %cst_6 = arith.constant dense<0.000000e+00> : vector<16x16xf32>
    %19 = tpu.matmul %16, %16, %cst_6 {dimension_numbers = #tpu.dot_dimension_numbers<[0], [0], [1], [1], [0, 1, 1, 1], [], []>} : vector<8x16xbf16>, vector<8x16xbf16>, vector<16x16xf32> -> vector<16x16xf32>
    %20 = arith.addf %18, %19 : vector<16x16xf32>
    %c0_7 = arith.constant 0 : index
    %c0_8 = arith.constant 0 : index
    %c0_9 = arith.constant 0 : index
    %21 = vector.load %arg3[%c0_7, %c0_8, %c0_9] : memref<1x16x16xf32, #tpu.memory_space<vmem>>, vector<1x16x16xf32>
    %22 = vector.shape_cast %21 : vector<1x16x16xf32> to vector<16x16xf32>
    %23 = vector.shape_cast %20 : vector<16x16xf32> to vector<1x16x16xf32>
    tpu.vector_store %arg3[%c0_7, %c0_8, %c0_9], %23 {strides = array<i32>} : memref<1x16x16xf32, #tpu.memory_space<vmem>>, vector<1x16x16xf32>,
    %c0_10 = arith.constant 0 : index
    %c0_11 = arith.constant 0 : index
    %24 = vector.load %arg4[%c0_10, %c0_11] : memref<8x16xf32, #tpu.memory_space<vmem>>, vector<8x16xf32>
    %25 = arith.extf %16 : vector<8x16xbf16> to vector<8x16xf32>
    %26 = vector.shape_cast %25 : vector<8x16xf32> to vector<1x8x16xf32>
    %cst_12 = arith.constant dense<0.000000e+00> : vector<8x16xf32>
    %27 = vector.multi_reduction <add>, %26, %cst_12 [0] : vector<1x8x16xf32> to vector<8x16xf32>
    %28 = arith.addf %24, %27 : vector<8x16xf32>
    %c0_13 = arith.constant 0 : index
    %c0_14 = arith.constant 0 : index
    %29 = vector.load %arg4[%c0_13, %c0_14] : memref<8x16xf32, #tpu.memory_space<vmem>>, vector<8x16xf32>
    tpu.vector_store %arg4[%c0_13, %c0_14], %28 {strides = array<i32>} : memref<8x16xf32, #tpu.memory_space<vmem>>, vector<8x16xf32>,
    return
  }
  func.func @transform_0(%arg0: i32, %arg1: i32) -> (i32, i32) {
    %c1_i32 = arith.constant 1 : i32
    %0 = arith.muli %arg0, %c1_i32 : i32
    %1 = arith.addi %0, %arg1 : i32
    %c0_i32 = arith.constant 0 : i32
    %2 = arith.minsi %1, %c0_i32 : i32
    %c0_i32_0 = arith.constant 0 : i32
    %c0_i32_1 = arith.constant 0 : i32
    return %2, %c0_i32_0 : i32, i32
  }
  func.func @transform_1(%arg0: i32, %arg1: i32) -> (i32, i32, i32) {
    %c0_i32 = arith.constant 0 : i32
    %c0_i32_0 = arith.constant 0 : i32
    %c0_i32_1 = arith.constant 0 : i32
    return %arg0, %c0_i32, %c0_i32_0 : i32, i32, i32
  }
  func.func @transform_2(%arg0: i32, %arg1: i32) -> (i32, i32) {
    %c0_i32 = arith.constant 0 : i32
    %c0_i32_0 = arith.constant 0 : i32
    return %arg0, %c0_i32 : i32, i32
  }
}

</mosaic_0001>

<bundles_post_ra>
// kernel: tpu_custom_call.1
= control target key start
LH: loop header
LB: loop body
LE: loop exit
PB: predicated region body
PF: predicated region fallthrough
CT: control target
= control target key end

     0   :  { %8 = vsyncpa [#allocation3], 0  ;;  %s316_s0 = inlined_call_operand.hbm [shape: f32[8,16], index: 0, kind: input, shape index: {}]   ;;  %s317_s1 = inlined_call_operand.hbm [shape: f32[1,16,16], index: 1, kind: output, shape index: {0}]   ;;  %s318_s2 = inlined_call_operand.hbm [shape: f32[8,16], index: 2, kind: output, shape index: {1}]  }
   0x1   :  { %9 = vsyncpa [#allocation4], 0 }
   0x2   :  { %10 = vsyncpa [#allocation7], 0  ;;  %s252_s9 = smov [#allocation2]   ;;  %s180_s13 = scalar_lea.hbm %s316_s0, 128 }
   0x3   :  { %s22_s10 = sshll.u32 %s252_s9, 4  ;;  %p181_p0 = scmp.ne.s32.totalorder %s316_s0, %s180_s13  ;;  %s23_s10 = int_to_ptr.vmem [resolvable:$true] %s22_s10 }
   0x4   :  { %p184_p1 = scmp.lt.u32.totalorder %s180_s13, %s316_s0 }
   0x6   :  { %p186_p2 = pnand %p184_p1, %p181_p0 }
   0x8   :  { %189 = shalt.err (!%p186_p2)
}
   0x9   :  { %s190_s18 = scalar_lea.vmem %s23_s10, 128  ;;  %p195_p4 = scmp.lt.s32.totalorder %s23_s10, %s23_s10 }
   0xa   :  { %p191_p3 = scmp.ne.s32.totalorder %s23_s10, %s190_s18  ;;  %p196_p5 = scmp.lt.s32.totalorder %s190_s18, %s190_s18 }
   0xc   :  { %p197_p6 = por %p196_p5, %p195_p4 }
   0xe   :  { %p198_p7 = pnand %p197_p6, %p191_p3 }
  0x10   :  { %201 = shalt.err (!%p198_p7)
}
  0x11   :  { %25 = dma.hbm_to_vmem [thread:$0]  %s316_s0, 128, %s23_s10, [#allocation3]  }
  0x12   :  { %246 = dma.done.wait [#allocation3], 128  }
  0x13   :  { %247 = vsyncadd [#allocation3], 4294967168  ;;  %vm37_vm0 = vcmask 130048   ;;  %v253_v0 = vmov 0.0   ;;  %vm254_vm1 = vmmov 0   ;;  %v48_v1 = vld [vmem:[#allocation2] sm:$0xff] }
  0x14   :  { %38 = vst.msk [vmem:[#allocation5] sm:$0xff] %vm37_vm0, %v253_v0  ;;  %39 = vst.msk [vmem:[#allocation5 + $0x8] sm:$0xff] %vm37_vm0, %v253_v0  ;;  %166 = vmatprep.subr.bf16.mxu0 %v253_v0  ;;  %168 = vmatprep.mubr.msk.bf16.mxu0 %vm254_vm1, %v253_v0  ;;  %vm75_vm2 = vcmask 1043456   ;;  %v52_v2 = vpack.c.bf16 %v48_v1, %v48_v1  ;;  %vm71_vm3 = vcmask 64512   ;;  %s255_s0 = smov [#allocation6]  }
  0x15   :  { %40 = vst.msk [vmem:[#allocation6] sm:$0xff] %vm37_vm0, %v253_v0  ;;  %s148_s21 = sshll.u32 %s255_s0, 4  ;;  %s149_s21 = int_to_ptr.vmem [resolvable:$true] %s148_s21 }
  0x16   :  { %55 = vxpose.xlu0.c.b16.start.end [1/1] (short) (narrow) %v52_v2, 16  ;;  %v77_v3 = vsel %vm75_vm2, %v52_v2, 0  ;;  %v126_v5 = vunpack.c.l.bf16 %v52_v2  ;;  %s202_s22 = scalar_lea.vmem %s149_s21, 128  ;;  %p207_p9 = scmp.lt.s32.totalorder %s149_s21, %s149_s21 }
  0x17   :  { %167 = vmatpush3.bf16.msra.mxu0 %v77_v3  ;;  %p203_p8 = scmp.ne.s32.totalorder %s149_s21, %s202_s22  ;;  %p208_p10 = scmp.lt.s32.totalorder %s202_s22, %s202_s22 }
  0x19   :  { %p209_p11 = por %p208_p10, %p207_p9 }
  0x1b   :  { %p210_p12 = pnand %p209_p11, %p203_p8 }
  0x1c   :  { %v125_v6 = vld [vmem:[#allocation6] sm:$0xff] }
  0x1d   :  { %v128_v7 = vadd.f32 %v126_v5, %v125_v6 }
  0x1f   :  { %129 = vst.msk [vmem:[#allocation6] sm:$0xff] %vm37_vm0, %v128_v7 }
  0x7c   :  { %v63_v4 = vpop.trf.xlu0 }
  0x7d   :  { %169 = vmatmul.mubr.msk.bf16.vlgmr.msra.gmra.mrb[0].mxu0 %vm71_vm3, %v63_v4 }
  0x7e   :  { %213 = shalt.err (!%p210_p12)
}
  0x7f   :  { %s214_s25 = scalar_lea.hbm %s318_s2, 128 }
  0x80   :  { %p215_p13 = scmp.ne.s32.totalorder %s318_s2, %s214_s25  ;;  %p218_p0 = scmp.lt.u32.totalorder %s214_s25, %s318_s2 }
  0x82   :  { %p220_p1 = pnand %p218_p0, %p215_p13 }
  0x84   :  { %223 = shalt.err (!%p220_p1)
}
  0x85   :  { %151 = dma.vmem_to_hbm [thread:$0]  %s149_s21, 128, %s318_s2, [#allocation7]   ;;  %v53_v8 = vld [vmem:[#allocation5] sm:$0xff]  ;;  %v54_v10 = vld [vmem:[#allocation5 + $0x8] sm:$0xff] }
  0x86   :  { %s256_s4 = smov [#allocation5]  }
  0x87   :  { %s135_s5 = sshll.u32 %s256_s4, 4  ;;  %s136_s5 = int_to_ptr.vmem [resolvable:$true] %s135_s5 }
  0x88   :  { %s224_s6 = scalar_lea.vmem %s136_s5, 256  ;;  %p229_p3 = scmp.lt.s32.totalorder %s136_s5, %s136_s5 }
  0x89   :  { %p225_p2 = scmp.ne.s32.totalorder %s136_s5, %s224_s6  ;;  %p230_p4 = scmp.lt.s32.totalorder %s224_s6, %s224_s6 }
  0x8b   :  { %p231_p5 = por %p230_p4, %p229_p3 }
  0x8d   :  { %p232_p6 = pnand %p231_p5, %p225_p2 }
 0x150   :  { %v113_v9 = vpop.f32.mrb[0].mxu0 }
 0x151   :  { %v120_v11 = vadd.f32 %v113_v9, %v53_v8  ;;  %v170_v12 = vpop.f32.mrb[1].mxu0 }
 0x152   :  { %v116_v13 = vpop.f32.mrb[2].mxu0 }
 0x153   :  { %123 = vst.msk [vmem:[#allocation5] sm:$0xff] %vm37_vm0, %v120_v11  ;;  %v121_v14 = vadd.f32 %v116_v13, %v54_v10  ;;  %v171_v15 = vpop.f32.mrb[3].mxu0 }
 0x155   :  { %124 = vst.msk [vmem:[#allocation5 + $0x8] sm:$0xff] %vm37_vm0, %v121_v14 }
 0x156   :  { %235 = shalt.err (!%p232_p6)
}
 0x157   :  { %s236_s8 = scalar_lea.hbm %s317_s1, 256 }
 0x158   :  { %p237_p7 = scmp.ne.s32.totalorder %s317_s1, %s236_s8  ;;  %p240_p8 = scmp.lt.u32.totalorder %s236_s8, %s317_s1 }
 0x15a   :  { %p242_p9 = pnand %p240_p8, %p237_p7 }
 0x15c   :  { %245 = shalt.err (!%p242_p9)
}
 0x15d   :  { %s257_s13 = smov 128   ;;  %s258_s14 = smov 8  }
 0x15e   :  { %141 = dma.vmem_to_hbm [thread:$0]  %s136_s5, 256, %s317_s1, [#allocation4], %s257_s13, %s257_s13, %s258_s14  }
 0x15f   :  { %248 = dma.done.wait [#allocation4], 256  }
 0x160   :  { %249 = vsyncadd [#allocation4], 4294967040 }
 0x161   :  { %250 = dma.done.wait [#allocation7], 128  }
 0x162   :  { %251 = vsyncadd [#allocation7], 4294967168 }
 0x163   :  { %158 = vsyncpa [#allocation3], 1 }
 0x164   :  { %159 = vsyncpa [#allocation4], 1 }
 0x165   :  { %160 = vsyncpa [#allocation7], 1 }

// kernel: tpu_custom_call.1
= control target key start
LH: loop header
LB: loop body
LE: loop exit
PB: predicated region body
PF: predicated region fallthrough
CT: control target
= control target key end

     0   :  { %8 = vsyncpa [#allocation3], 0  ;;  %s316_s0 = inlined_call_operand.hbm [shape: f32[8,16], index: 0, kind: input, shape index: {}]   ;;  %s317_s1 = inlined_call_operand.hbm [shape: f32[1,16,16], index: 1, kind: output, shape index: {0}]   ;;  %s318_s2 = inlined_call_operand.hbm [shape: f32[8,16], index: 2, kind: output, shape index: {1}]  }
   0x1   :  { %9 = vsyncpa [#allocation4], 0 }
   0x2   :  { %10 = vsyncpa [#allocation7], 0  ;;  %s252_s9 = smov [#allocation2]   ;;  %s180_s13 = scalar_lea.hbm %s316_s0, 128 }
   0x3   :  { %s22_s10 = sshll.u32 %s252_s9, 4  ;;  %p181_p0 = scmp.ne.s32.totalorder %s316_s0, %s180_s13  ;;  %s23_s10 = int_to_ptr.vmem [resolvable:$true] %s22_s10 }
   0x4   :  { %p184_p1 = scmp.lt.u32.totalorder %s180_s13, %s316_s0 }
   0x6   :  { %p186_p2 = pnand %p184_p1, %p181_p0 }
   0x8   :  { %189 = shalt.err (!%p186_p2)
}
   0x9   :  { %s190_s18 = scalar_lea.vmem %s23_s10, 128  ;;  %p195_p4 = scmp.lt.s32.totalorder %s23_s10, %s23_s10 }
   0xa   :  { %p191_p3 = scmp.ne.s32.totalorder %s23_s10, %s190_s18  ;;  %p196_p5 = scmp.lt.s32.totalorder %s190_s18, %s190_s18 }
   0xc   :  { %p197_p6 = por %p196_p5, %p195_p4 }
   0xe   :  { %p198_p7 = pnand %p197_p6, %p191_p3 }
  0x10   :  { %201 = shalt.err (!%p198_p7)
}
  0x11   :  { %25 = dma.hbm_to_vmem [thread:$0]  %s316_s0, 128, %s23_s10, [#allocation3]  }
  0x12   :  { %246 = dma.done.wait [#allocation3], 128  }
  0x13   :  { %247 = vsyncadd [#allocation3], 4294967168  ;;  %vm37_vm0 = vcmask 130048   ;;  %v253_v0 = vmov 0.0   ;;  %vm254_vm1 = vmmov 0   ;;  %v48_v1 = vld [vmem:[#allocation2] sm:$0xff] }
  0x14   :  { %38 = vst.msk [vmem:[#allocation5] sm:$0xff] %vm37_vm0, %v253_v0  ;;  %39 = vst.msk [vmem:[#allocation5 + $0x8] sm:$0xff] %vm37_vm0, %v253_v0  ;;  %166 = vmatprep.subr.bf16.mxu0 %v253_v0  ;;  %168 = vmatprep.mubr.msk.bf16.mxu0 %vm254_vm1, %v253_v0  ;;  %vm75_vm2 = vcmask 1043456   ;;  %v52_v2 = vpack.c.bf16 %v48_v1, %v48_v1  ;;  %vm71_vm3 = vcmask 64512   ;;  %s255_s0 = smov [#allocation6]  }
  0x15   :  { %40 = vst.msk [vmem:[#allocation6] sm:$0xff] %vm37_vm0, %v253_v0  ;;  %s148_s21 = sshll.u32 %s255_s0, 4  ;;  %s149_s21 = int_to_ptr.vmem [resolvable:$true] %s148_s21 }
  0x16   :  { %55 = vxpose.xlu0.c.b16.start.end [1/1] (short) (narrow) %v52_v2, 16  ;;  %v77_v3 = vsel %vm75_vm2, %v52_v2, 0  ;;  %v126_v5 = vunpack.c.l.bf16 %v52_v2  ;;  %s202_s22 = scalar_lea.vmem %s149_s21, 128  ;;  %p207_p9 = scmp.lt.s32.totalorder %s149_s21, %s149_s21 }
  0x17   :  { %167 = vmatpush3.bf16.msra.mxu0 %v77_v3  ;;  %p203_p8 = scmp.ne.s32.totalorder %s149_s21, %s202_s22  ;;  %p208_p10 = scmp.lt.s32.totalorder %s202_s22, %s202_s22 }
  0x19   :  { %p209_p11 = por %p208_p10, %p207_p9 }
  0x1b   :  { %p210_p12 = pnand %p209_p11, %p203_p8 }
  0x1c   :  { %v125_v6 = vld [vmem:[#allocation6] sm:$0xff] }
  0x1d   :  { %v128_v7 = vadd.f32 %v126_v5, %v125_v6 }
  0x1f   :  { %129 = vst.msk [vmem:[#allocation6] sm:$0xff] %vm37_vm0, %v128_v7 }
  0x7c   :  { %v63_v4 = vpop.trf.xlu0 }
  0x7d   :  { %169 = vmatmul.mubr.msk.bf16.vlgmr.msra.gmra.mrb[0].mxu0 %vm71_vm3, %v63_v4 }
  0x7e   :  { %213 = shalt.err (!%p210_p12)
}
  0x7f   :  { %s214_s25 = scalar_lea.hbm %s318_s2, 128 }
  0x80   :  { %p215_p13 = scmp.ne.s32.totalorder %s318_s2, %s214_s25  ;;  %p218_p0 = scmp.lt.u32.totalorder %s214_s25, %s318_s2 }
  0x82   :  { %p220_p1 = pnand %p218_p0, %p215_p13 }
  0x84   :  { %223 = shalt.err (!%p220_p1)
}
  0x85   :  { %151 = dma.vmem_to_hbm [thread:$0]  %s149_s21, 128, %s318_s2, [#allocation7]   ;;  %v53_v8 = vld [vmem:[#allocation5] sm:$0xff]  ;;  %v54_v10 = vld [vmem:[#allocation5 + $0x8] sm:$0xff] }
  0x86   :  { %s256_s4 = smov [#allocation5]  }
  0x87   :  { %s135_s5 = sshll.u32 %s256_s4, 4  ;;  %s136_s5 = int_to_ptr.vmem [resolvable:$true] %s135_s5 }
  0x88   :  { %s224_s6 = scalar_lea.vmem %s136_s5, 256  ;;  %p229_p3 = scmp.lt.s32.totalorder %s136_s5, %s136_s5 }
  0x89   :  { %p225_p2 = scmp.ne.s32.totalorder %s136_s5, %s224_s6  ;;  %p230_p4 = scmp.lt.s32.totalorder %s224_s6, %s224_s6 }
  0x8b   :  { %p231_p5 = por %p230_p4, %p229_p3 }
  0x8d   :  { %p232_p6 = pnand %p231_p5, %p225_p2 }
 0x150   :  { %v113_v9 = vpop.f32.mrb[0].mxu0 }
 0x151   :  { %v120_v11 = vadd.f32 %v113_v9, %v53_v8  ;;  %v170_v12 = vpop.f32.mrb[1].mxu0 }
 0x152   :  { %v116_v13 = vpop.f32.mrb[2].mxu0 }
 0x153   :  { %123 = vst.msk [vmem:[#allocation5] sm:$0xff] %vm37_vm0, %v120_v11  ;;  %v121_v14 = vadd.f32 %v116_v13, %v54_v10  ;;  %v171_v15 = vpop.f32.mrb[3].mxu0 }
 0x155   :  { %124 = vst.msk [vmem:[#allocation5 + $0x8] sm:$0xff] %vm37_vm0, %v121_v14 }
 0x156   :  { %235 = shalt.err (!%p232_p6)
}
 0x157   :  { %s236_s8 = scalar_lea.hbm %s317_s1, 256 }
 0x158   :  { %p237_p7 = scmp.ne.s32.totalorder %s317_s1, %s236_s8  ;;  %p240_p8 = scmp.lt.u32.totalorder %s236_s8, %s317_s1 }
 0x15a   :  { %p242_p9 = pnand %p240_p8, %p237_p7 }
 0x15c   :  { %245 = shalt.err (!%p242_p9)
}
 0x15d   :  { %s257_s13 = smov 128   ;;  %s258_s14 = smov 8  }
 0x15e   :  { %141 = dma.vmem_to_hbm [thread:$0]  %s136_s5, 256, %s317_s1, [#allocation4], %s257_s13, %s257_s13, %s258_s14  }
 0x15f   :  { %248 = dma.done.wait [#allocation4], 256  }
 0x160   :  { %249 = vsyncadd [#allocation4], 4294967040 }
 0x161   :  { %250 = dma.done.wait [#allocation7], 128  }
 0x162   :  { %251 = vsyncadd [#allocation7], 4294967168 }
 0x163   :  { %158 = vsyncpa [#allocation3], 1 }
 0x164   :  { %159 = vsyncpa [#allocation4], 1 }
 0x165   :  { %160 = vsyncpa [#allocation7], 1 }

</bundles_post_ra>
